<compile_context>
chip_gen: v5e
topology: v5e:2x2
jax: 0.10.0
libtpu: 0.0.40
codegen_flags: <defaults>
</compile_context>

<pallas_src>
import math
import numpy as np
import jax
import jax.numpy as jnp
from jax.experimental import pallas as pl
from jax.experimental.pallas import tpu as pltpu

ORDER = 256
N_BIT = int(math.log2(ORDER))           # 8
HALF = N_BIT // 2                       # 4
LOWER_MASK = (1 << HALF) - 1            # 0x0F
OFFSET = ORDER ** 0.5 / 2 - 0.5         # 7.5


def cal_avg_power(order):
    avg_power = []
    for i in range(int(math.sqrt(order) / 2)):
        avg_power.append((i + 0.5) ** 2)
    avg_power = np.array(avg_power)
    return float(np.sqrt(2 * np.sum(avg_power) / len(avg_power)))


AVG_POWER = cal_avg_power(ORDER)

# Fold (v - OFFSET) / AVG_POWER  ->  v * SCALE + BIAS  (saves VALU ops).
SCALE = 1.0 / AVG_POWER
BIAS = -OFFSET / AVG_POWER


def qam_kernel(x_ref, out_ref):
    x = x_ref[...]
    # ((x + 1) / 2 * 255).int() — truncation toward zero, same as torch .int().
    # Kept in this exact op order for trunc-boundary parity with the reference.
    # NOTE: like the PyTorch module, no clamp — inputs are assumed in [-1, 1].
    q = ((x + 1.0) * 0.5 * 255.0).astype(jnp.int32)

    lower = jnp.bitwise_and(q, LOWER_MASK)
    upper = jnp.bitwise_and(jnp.right_shift(q, HALF), LOWER_MASK)

    # Gray coding: v ^ (v >> 1)
    lower = jnp.bitwise_xor(lower, jnp.right_shift(lower, 1))
    upper = jnp.bitwise_xor(upper, jnp.right_shift(upper, 1))

    scale = jnp.float32(SCALE)
    bias = jnp.float32(BIAS)
    out_ref[0] = lower.astype(jnp.float32) * scale + bias
    out_ref[1] = upper.astype(jnp.float32) * scale + bias


def qam_modulate(x, modulating=True, channels_last=True):
    """x: (B, N) float32 in [-1, 1].

    Returns (B, N, 2) float32 (PyTorch layout) if channels_last=True,
    otherwise the kernel-native lane-dense (2, B, N) layout (no extra HBM
    round-trip).
    """
    if not modulating:
        return x
    B, N = x.shape

    # Tile sizes: multiples of (8, 128) unless they cover the full dim.
    # (512, 512) f32 => 1 MiB input + 2 MiB output per tile, x2 buffers = 6 MiB
    # VMEM — fits the default scoped limit on v5e (16 MiB) and v6e/v7x (32 MiB)
    # while keeping double-buffering alive.
    tb = B if B <= 512 else 512
    tn = N if N <= 512 else 512
    grid = (pl.cdiv(B, tb), pl.cdiv(N, tn))

    planes = pl.pallas_call(
        qam_kernel,
        out_shape=jax.ShapeDtypeStruct((2, B, N), jnp.float32),
        grid=grid,
        in_specs=[pl.BlockSpec((tb, tn), lambda i, j: (i, j))],
        out_specs=pl.BlockSpec((2, tb, tn), lambda i, j: (0, i, j)),
        compiler_params=pltpu.CompilerParams(
            dimension_semantics=("parallel", "parallel")),
    )(x)

    if channels_last:
        # torch.stack([lower_bit, upper_bit], axis=2) layout — pure layout
        # glue outside the kernel; skip it (channels_last=False) if the
        # consumer can read (2, B, N) directly.
        return jnp.moveaxis(planes, 0, 2)
    return planes


def qam_reference(x):
    """Pure-numpy reference mirroring the PyTorch forward (output (B, N, 2))."""
    x = np.asarray(x)
    quantized = np.trunc((x + 1.0) / 2.0 * 255.0).astype(np.int32)
    lower = quantized & LOWER_MASK
    upper = (quantized & (LOWER_MASK << HALF)) >> HALF
    out = np.stack([lower, upper], axis=2)
    out = out ^ (out >> 1)
    return (out.astype(np.float32) - OFFSET) / AVG_POWER


if __name__ == "__main__":
    key = jax.random.PRNGKey(0)

    # Small shape consistent with the module's (batch, sequence) input.
    B, N = 8, 256
    x = jax.random.uniform(key, (B, N), dtype=jnp.float32, minval=-1.0, maxval=1.0)
    out = jax.block_until_ready(qam_modulate(x, modulating=True))
    ref = qam_reference(np.asarray(x))
    np.testing.assert_allclose(np.asarray(out), ref, rtol=1e-6, atol=1e-6)
    assert out.shape == (B, N, 2)

    # Second shape exercising the tiled grid incl. ragged edge tiles.
    B2, N2 = 600, 1152  # grid (2, 3); last column tile is partial (128 wide)
    x2 = jax.random.uniform(jax.random.PRNGKey(1), (B2, N2), dtype=jnp.float32,
                            minval=-1.0, maxval=1.0)
    out2 = jax.block_until_ready(qam_modulate(x2, modulating=True))
    ref2 = qam_reference(np.asarray(x2))
    np.testing.assert_allclose(np.asarray(out2), ref2, rtol=1e-6, atol=1e-6)
    assert out2.shape == (B2, N2, 2)

    # Kernel-native lane-dense layout path.
    planes = jax.block_until_ready(
        qam_modulate(x2, modulating=True, channels_last=False))
    np.testing.assert_allclose(np.asarray(planes),
                               np.moveaxis(ref2, 2, 0), rtol=1e-6, atol=1e-6)

    print("KERNEL_OK")
</pallas_src>

<mosaic_0001>
module attributes {stable_mosaic.version = 11 : i64} {
  func.func @qam_kernel(%arg0: i32, %arg1: i32, %arg2: memref<8x256xf32, #tpu.memory_space<vmem>>, %arg3: memref<2x8x256xf32, #tpu.memory_space<vmem>>) attributes {dimension_semantics = [#tpu.dimension_semantics<parallel>, #tpu.dimension_semantics<parallel>], iteration_bounds = array<i64: 1, 1>, scalar_prefetch = 0 : i64, scratch_operands = 0 : i64, tpu.core_type = #tpu.core_type<tc>, window_params = [{transform_indices = @transform_0, window_bounds = array<i64: 8, 256>}, {transform_indices = @transform_1, window_bounds = array<i64: 2, 8, 256>}]} {
    %c0 = arith.constant 0 : index
    %c0_0 = arith.constant 0 : index
    %0 = vector.load %arg2[%c0, %c0_0] : memref<8x256xf32, #tpu.memory_space<vmem>>, vector<8x256xf32>
    %cst = arith.constant 1.000000e+00 : f32
    %1 = vector.broadcast %cst : f32 to vector<8x256xf32>
    %2 = arith.addf %0, %1 : vector<8x256xf32>
    %cst_1 = arith.constant 5.000000e-01 : f32
    %3 = vector.broadcast %cst_1 : f32 to vector<8x256xf32>
    %4 = arith.mulf %2, %3 : vector<8x256xf32>
    %cst_2 = arith.constant 2.550000e+02 : f32
    %5 = vector.broadcast %cst_2 : f32 to vector<8x256xf32>
    %6 = arith.mulf %4, %5 : vector<8x256xf32>
    %7 = arith.fptosi %6 : vector<8x256xf32> to vector<8x256xi32>
    %c15_i32 = arith.constant 15 : i32
    %8 = vector.broadcast %c15_i32 : i32 to vector<8x256xi32>
    %9 = arith.andi %7, %8 : vector<8x256xi32>
    %c4_i32 = arith.constant 4 : i32
    %10 = vector.broadcast %c4_i32 : i32 to vector<8x256xi32>
    %11 = arith.shrsi %7, %10 : vector<8x256xi32>
    %c15_i32_3 = arith.constant 15 : i32
    %12 = vector.broadcast %c15_i32_3 : i32 to vector<8x256xi32>
    %13 = arith.andi %11, %12 : vector<8x256xi32>
    %c1_i32 = arith.constant 1 : i32
    %14 = vector.broadcast %c1_i32 : i32 to vector<8x256xi32>
    %15 = arith.shrsi %9, %14 : vector<8x256xi32>
    %16 = arith.xori %9, %15 : vector<8x256xi32>
    %c1_i32_4 = arith.constant 1 : i32
    %17 = vector.broadcast %c1_i32_4 : i32 to vector<8x256xi32>
    %18 = arith.shrsi %13, %17 : vector<8x256xi32>
    %19 = arith.xori %13, %18 : vector<8x256xi32>
    %20 = arith.sitofp %16 : vector<8x256xi32> to vector<8x256xf32>
    %cst_5 = arith.constant 1.533930e-01 : f32
    %21 = vector.broadcast %cst_5 : f32 to vector<8x256xf32>
    %22 = arith.mulf %20, %21 : vector<8x256xf32>
    %cst_6 = arith.constant -1.15044749 : f32
    %23 = vector.broadcast %cst_6 : f32 to vector<8x256xf32>
    %24 = arith.addf %22, %23 : vector<8x256xf32>
    %c0_7 = arith.constant 0 : index
    %c0_8 = arith.constant 0 : index
    %c0_9 = arith.constant 0 : index
    %25 = vector.load %arg3[%c0_7, %c0_8, %c0_9] : memref<2x8x256xf32, #tpu.memory_space<vmem>>, vector<1x8x256xf32>
    %26 = vector.shape_cast %25 : vector<1x8x256xf32> to vector<8x256xf32>
    %27 = vector.shape_cast %24 : vector<8x256xf32> to vector<1x8x256xf32>
    tpu.vector_store %arg3[%c0_7, %c0_8, %c0_9], %27 {strides = array<i32>} : memref<2x8x256xf32, #tpu.memory_space<vmem>>, vector<1x8x256xf32>,
    %28 = arith.sitofp %19 : vector<8x256xi32> to vector<8x256xf32>
    %cst_10 = arith.constant 1.533930e-01 : f32
    %29 = vector.broadcast %cst_10 : f32 to vector<8x256xf32>
    %30 = arith.mulf %28, %29 : vector<8x256xf32>
    %cst_11 = arith.constant -1.15044749 : f32
    %31 = vector.broadcast %cst_11 : f32 to vector<8x256xf32>
    %32 = arith.addf %30, %31 : vector<8x256xf32>
    %c1 = arith.constant 1 : index
    %c0_12 = arith.constant 0 : index
    %c0_13 = arith.constant 0 : index
    %33 = vector.load %arg3[%c1, %c0_12, %c0_13] : memref<2x8x256xf32, #tpu.memory_space<vmem>>, vector<1x8x256xf32>
    %34 = vector.shape_cast %33 : vector<1x8x256xf32> to vector<8x256xf32>
    %35 = vector.shape_cast %32 : vector<8x256xf32> to vector<1x8x256xf32>
    tpu.vector_store %arg3[%c1, %c0_12, %c0_13], %35 {strides = array<i32>} : memref<2x8x256xf32, #tpu.memory_space<vmem>>, vector<1x8x256xf32>,
    return
  }
  func.func @transform_0(%arg0: i32, %arg1: i32) -> (i32, i32) {
    %c0_i32 = arith.constant 0 : i32
    return %arg0, %arg1 : i32, i32
  }
  func.func @transform_1(%arg0: i32, %arg1: i32) -> (i32, i32, i32) {
    %c0_i32 = arith.constant 0 : i32
    %c0_i32_0 = arith.constant 0 : i32
    return %c0_i32, %arg0, %arg1 : i32, i32, i32
  }
}

</mosaic_0001>

<bundles_post_ra>
// kernel: tpu_custom_call.1
= control target key start
LH: loop header
LB: loop body
LE: loop exit
PB: predicated region body
PF: predicated region fallthrough
CT: control target
= control target key end

     0   :  { %6 = vsyncpa [#allocation3], 0  ;;  %s169_s0 = inlined_call_operand.hbm [shape: f32[8,256], index: 0, kind: input, shape index: {}]   ;;  %s170_s1 = inlined_call_operand.hbm [shape: f32[2,8,256], index: 1, kind: output, shape index: {}]  }
   0x1   :  { %7 = vsyncpa [#allocation4], 0  ;;  %s13_s8 = sshll.u32 %s169_s0, 4  ;;  %s149_s9 = smov [#allocation2]   ;;  %s14_s8 = int_to_ptr.hbm [resolvable:$true] %s13_s8 }
   0x2   :  { %s15_s10 = sshll.u32 %s149_s9, 4  ;;  %s16_s10 = int_to_ptr.vmem [resolvable:$true] %s15_s10 }
   0x3   :  { %18 = dma.hbm_to_vmem [thread:$0]  %s14_s8, 256, %s16_s10, [#allocation3]  }
   0x4   :  { %145 = dma.done.wait [#allocation3], 256  }
   0x5   :  { %146 = vsyncadd [#allocation3], 4294967040  ;;  %v23_v0 = vld [vmem:[#allocation2] sm:$0xff]  ;;  %v24_v1 = vld [vmem:[#allocation2 + $0x8] sm:$0xff]  ;;  %s150_s0 = smov [#allocation5]   ;;  %s70_s14 = sshll.u32 %s170_s1, 4  ;;  %s71_s14 = int_to_ptr.hbm [resolvable:$true] %s70_s14 }
   0x6   :  { %v25_v2 = vadd.f32 1.0, %v23_v0  ;;  %v26_v3 = vadd.f32 1.0, %v24_v1  ;;  %s68_s11 = sshll.u32 %s150_s0, 4  ;;  %s151_s15 = smov 256   ;;  %s69_s11 = int_to_ptr.vmem [resolvable:$true] %s68_s11 }
   0x7   :  { %s152_s16 = smov 16  }
   0x8   :  { %v27_v4 = vmul.f32 0.5, %v25_v2  ;;  %v28_v5 = vmul.f32 0.5, %v26_v3 }
   0xa   :  { %v29_v6 = vmul.f32 255.0, %v27_v4  ;;  %v30_v7 = vmul.f32 255.0, %v28_v5 }
   0xc   :  { %vm83_vm0 = vcmp.lt.s32.totalorder %v29_v6, 0  ;;  %v84_v8 = vceil.f32 %v29_v6  ;;  %v85_v9 = vfloor.f32 %v29_v6  ;;  %vm88_vm1 = vcmp.lt.s32.totalorder %v30_v7, 0 }
   0xd   :  { %v89_v10 = vceil.f32 %v30_v7  ;;  %v90_v11 = vfloor.f32 %v30_v7 }
   0xe   :  { %v86_v12 = vsel %vm83_vm0, %v84_v8, %v85_v9 }
   0xf   :  { %v87_v13 = vcvt.f32.s32 %v86_v12  ;;  %v91_v14 = vsel %vm88_vm1, %v89_v10, %v90_v11 }
  0x10   :  { %v92_v15 = vcvt.f32.s32 %v91_v14 }
  0x11   :  { %v33_v16 = vand.u32 15, %v87_v13  ;;  %v35_v17 = vshra.s32 %v87_v13, 4 }
  0x12   :  { %v34_v18 = vand.u32 15, %v92_v15  ;;  %v36_v19 = vshra.s32 %v92_v15, 4 }
  0x13   :  { %v39_v20 = vshra.s32 %v33_v16, 1  ;;  %v37_v21 = vand.u32 15, %v35_v17 }
  0x14   :  { %v40_v22 = vshra.s32 %v34_v18, 1  ;;  %v38_v23 = vand.u32 15, %v36_v19 }
  0x15   :  { %v41_v24 = vxor.u32 %v39_v20, %v33_v16  ;;  %v43_v25 = vshra.s32 %v37_v21, 1 }
  0x16   :  { %v42_v26 = vxor.u32 %v40_v22, %v34_v18  ;;  %v44_v27 = vshra.s32 %v38_v23, 1 }
  0x17   :  { %v47_v28 = vcvt.s32.f32 %v41_v24  ;;  %v45_v29 = vxor.u32 %v43_v25, %v37_v21 }
  0x18   :  { %v48_v30 = vcvt.s32.f32 %v42_v26  ;;  %v46_v31 = vxor.u32 %v44_v27, %v38_v23 }
  0x19   :  { %v49_v32 = vmul.f32 0.153393, %v47_v28  ;;  %v55_v33 = vcvt.s32.f32 %v45_v29 }
  0x1a   :  { %v50_v34 = vmul.f32 0.153393, %v48_v30  ;;  %v56_v35 = vcvt.s32.f32 %v46_v31 }
  0x1b   :  { %v51_v36 = vadd.f32 -1.1504475, %v49_v32  ;;  %v57_v37 = vmul.f32 0.153393, %v55_v33 }
  0x1c   :  { %v52_v38 = vadd.f32 -1.1504475, %v50_v34  ;;  %v58_v39 = vmul.f32 0.153393, %v56_v35 }
  0x1d   :  { %53 = vst [vmem:[#allocation5] sm:$0xff] %v51_v36  ;;  %v59_v40 = vadd.f32 -1.1504475, %v57_v37 }
  0x1e   :  { %54 = vst [vmem:[#allocation5 + $0x8] sm:$0xff] %v52_v38  ;;  %v60_v41 = vadd.f32 -1.1504475, %v58_v39 }
  0x1f   :  { %62 = vst [vmem:[#allocation5 + $0x10] sm:$0xff] %v59_v40 }
  0x20   :  { %63 = vst [vmem:[#allocation5 + $0x18] sm:$0xff] %v60_v41 }
  0x21   :  { %76 = dma.vmem_to_hbm [thread:$0]  %s69_s11, 512, %s71_s14, [#allocation4], %s151_s15, %s151_s15, %s152_s16  }
  0x22   :  { %147 = dma.done.wait [#allocation4], 512  }
  0x23   :  { %148 = vsyncadd [#allocation4], 4294966784 }
  0x24   :  { %81 = vsyncpa [#allocation3], 1 }
  0x25   :  { %82 = vsyncpa [#allocation4], 1 }

</bundles_post_ra>
